<compile_context>
chip_gen: v6e
topology: v6e:2x2x1
jax: 0.10.0
libtpu: 0.0.40
codegen_flags: <defaults>
</compile_context>

<pallas_src>
import functools
import math

import jax
import jax.numpy as jnp
import numpy as np
from jax.experimental import pallas as pl
from jax.experimental.pallas import tpu as pltpu


_PI = 3.14159265  # same truncated constant as the PyTorch module


def _round_up(v, m):
    return ((v + m - 1) // m) * m


def _cos_m_theta(cos, m):
    """mlambda[m] from the PyTorch module (Chebyshev polynomials of cos(theta))."""
    if m == 0:
        return jnp.ones_like(cos)
    if m == 1:
        return cos
    if m == 2:
        return 2.0 * cos * cos - 1.0
    if m == 3:
        return (4.0 * cos * cos - 3.0) * cos
    if m == 4:
        c2 = cos * cos
        return 8.0 * c2 * c2 - 8.0 * c2 + 1.0
    if m == 5:
        c2 = cos * cos
        return ((16.0 * c2 - 20.0) * c2 + 5.0) * cos
    raise ValueError("m must be in [0, 5]")


# ---------------------------------------------------------------------------
# Pass 1: row-wise L2 normalization of the weight matrix (hoisted out of the
# (batch-tile, class-tile) loop of the main kernel).
# ---------------------------------------------------------------------------
def _normalize_rows_kernel(w_ref, out_ref):
    w = w_ref[...]                                           # (tw, D) f32
    ss = jnp.sum(w * w, axis=1, keepdims=True)               # (tw, 1)
    inv = jax.lax.rsqrt(jnp.maximum(ss, 1e-24))              # ~ 1/max(||w||, 1e-12)
    out_ref[...] = w * inv


# ---------------------------------------------------------------------------
# Pass 2: the SphereProduct forward per (batch-tile i, class-tile j).
# ---------------------------------------------------------------------------
def _sphere_product_kernel(params_ref, x_ref, wn_ref, label_ref, out_ref, *, m):
    inv_one_plus_lamb = params_ref[0]                        # SMEM scalar (runtime)

    x = x_ref[...]                                           # (tm, D) f32
    wn = wn_ref[...]                                         # (tn, D) f32, pre-normalized
    label = label_ref[...]                                   # (tm, 1) i32 global class id

    # F.normalize(input): rsqrt-multiply, reuse ss*inv as the feature norm.
    ss = jnp.sum(x * x, axis=1, keepdims=True)               # (tm, 1)
    inv_norm = jax.lax.rsqrt(jnp.maximum(ss, 1e-24))
    xn = x * inv_norm                                        # normalized rows
    x_norm = ss * inv_norm                                   # == ||x|| (torch.norm(input,2,1))

    # cos_theta = xn @ wn.T  -> MXU, f32 accumulate
    cos_theta = jax.lax.dot_general(
        xn, wn,
        dimension_numbers=(((1,), (1,)), ((), ())),
        preferred_element_type=jnp.float32,
    )
    cos_theta = jnp.clip(cos_theta, -1.0, 1.0)               # (tm, tn)

    cos_m_theta = _cos_m_theta(cos_theta, m)

    # k = floor(m * acos(cos_theta) / PI), computed by threshold counting
    # (acos is monotone decreasing: floor(m*acos(x)/PI) >= j  <=>  x <= cos(j*PI/m)).
    # Sign (-1)^k via boolean parity (no float mod).
    k = jnp.zeros_like(cos_theta)
    parity = jnp.zeros(cos_theta.shape, dtype=jnp.bool_)
    for j in range(1, m + 1):
        hit = cos_theta <= math.cos(j * _PI / m)
        k = k + hit.astype(jnp.float32)
        parity = parity ^ hit
    sign = jnp.where(parity, -1.0, 1.0)
    phi_theta = sign * cos_m_theta - 2.0 * k

    # one_hot margin blend without materializing a one-hot array.
    tm, tn = out_ref.shape
    col = jax.lax.broadcasted_iota(jnp.int32, (tm, tn), 1) + pl.program_id(1) * tn
    out = jnp.where(
        col == label,
        cos_theta + (phi_theta - cos_theta) * inv_one_plus_lamb,
        cos_theta,
    )
    out_ref[...] = out * x_norm                              # NormOfFeature.view(-1, 1)


# ---------------------------------------------------------------------------
# Wrapper: padding, tiling, the two pallas_calls.
# ---------------------------------------------------------------------------
def sphere_product(x, weight, label, *, m=4, iter_count=1,
                   base=1000.0, gamma=0.12, power=1, lambda_min=5.0):
    """Forward pass of SphereProduct (one call == one self.iter increment)."""
    n, d = x.shape
    c, d_w = weight.shape
    assert d == d_w, "feature dims of input and weight must match"

    # lamb schedule: computed on host / in XLA, passed to the kernel as runtime data
    # (SMEM scalar) so changing iter_count never recompiles the Pallas kernel.
    lamb = jnp.maximum(lambda_min, base * (1.0 + gamma * iter_count) ** (-power))
    params = (1.0 / (1.0 + lamb)).astype(jnp.float32).reshape(1)

    # Tile sizes: lane-dense output (tn multiple of 128, up to 512), tm multiple of 8
    # (up to 256), full feature dim (padded to a multiple of 128) per tile.
    d_pad = _round_up(d, 128)
    tm = min(256, _round_up(n, 8))
    tn = min(512, _round_up(c, 128))
    n_pad = _round_up(n, tm)
    c_pad = _round_up(c, tn)

    x_p = jnp.pad(x.astype(jnp.float32), ((0, n_pad - n), (0, d_pad - d)))
    w_p = jnp.pad(weight.astype(jnp.float32), ((0, c_pad - c), (0, d_pad - d)))
    label_p = jnp.pad(label.reshape(-1).astype(jnp.int32), (0, n_pad - n),
                      constant_values=-1).reshape(n_pad, 1)

    # ---- Pass 1: normalize weight rows once. ----
    tw = 128  # c_pad is always a multiple of 128
    wn = pl.pallas_call(
        _normalize_rows_kernel,
        out_shape=jax.ShapeDtypeStruct((c_pad, d_pad), jnp.float32),
        grid=(c_pad // tw,),
        in_specs=[pl.BlockSpec((tw, d_pad), lambda i: (i, 0))],
        out_specs=pl.BlockSpec((tw, d_pad), lambda i: (i, 0)),
        compiler_params=pltpu.CompilerParams(
            dimension_semantics=("parallel",)),
    )(w_p)

    # ---- Pass 2: tiled SphereProduct. ----
    grid = (n_pad // tm, c_pad // tn)
    out_p = pl.pallas_call(
        functools.partial(_sphere_product_kernel, m=m),
        out_shape=jax.ShapeDtypeStruct((n_pad, c_pad), jnp.float32),
        grid=grid,
        in_specs=[
            pl.BlockSpec(memory_space=pltpu.MemorySpace.SMEM),    # 1/(1+lamb) scalar
            pl.BlockSpec((tm, d_pad), lambda i, j: (i, 0)),       # x batch tile
            pl.BlockSpec((tn, d_pad), lambda i, j: (j, 0)),       # normalized weight tile
            pl.BlockSpec((tm, 1), lambda i, j: (i, 0)),           # labels for batch tile
        ],
        out_specs=pl.BlockSpec((tm, tn), lambda i, j: (i, j)),
        compiler_params=pltpu.CompilerParams(
            dimension_semantics=("parallel", "parallel"),
            vmem_limit_bytes=32 * 1024 * 1024,
        ),
    )(params, x_p, wn, label_p)

    return out_p[:n, :c]


# ---------------------------------------------------------------------------
# Pure-JAX reference (mirrors the PyTorch forward) for a correctness check.
# ---------------------------------------------------------------------------
def sphere_product_reference(x, weight, label, *, m=4, iter_count=1):
    lamb = max(5.0, 1000.0 * (1.0 + 0.12 * iter_count) ** (-1))
    xn = x / jnp.maximum(jnp.linalg.norm(x, axis=1, keepdims=True), 1e-12)
    wn = weight / jnp.maximum(jnp.linalg.norm(weight, axis=1, keepdims=True), 1e-12)
    cos_theta = jnp.clip(xn @ wn.T, -1.0, 1.0)
    mlambda = [
        lambda v: v ** 0, lambda v: v,
        lambda v: 2 * v ** 2 - 1, lambda v: 4 * v ** 3 - 3 * v,
        lambda v: 8 * v ** 4 - 8 * v ** 2 + 1,
        lambda v: 16 * v ** 5 - 20 * v ** 3 + 5 * v,
    ]
    cos_m_theta = mlambda[m](cos_theta)
    theta = jnp.arccos(cos_theta)
    k = jnp.floor(m * theta / _PI)
    sign = 1.0 - 2.0 * jnp.mod(k, 2.0)                        # (-1)^k for integer k
    phi_theta = sign * cos_m_theta - 2.0 * k
    norm = jnp.linalg.norm(x, axis=1, keepdims=True)
    one_hot = jax.nn.one_hot(label, weight.shape[0], dtype=x.dtype)
    out = one_hot * (phi_theta - cos_theta) / (1.0 + lamb) + cos_theta
    return out * norm


if __name__ == "__main__":
    key = jax.random.PRNGKey(0)
    k_x, k_w, k_l = jax.random.split(key, 3)

    N, IN_FEATURES, OUT_FEATURES, M = 8, 32, 16, 4

    x = jax.random.normal(k_x, (N, IN_FEATURES), dtype=jnp.float32)

    # Deterministic xavier_uniform-style init for weight (out_features, in_features)
    bound = math.sqrt(6.0 / (IN_FEATURES + OUT_FEATURES))
    weight = jax.random.uniform(
        k_w, (OUT_FEATURES, IN_FEATURES), dtype=jnp.float32,
        minval=-bound, maxval=bound,
    )
    label = jax.random.randint(k_l, (N,), 0, OUT_FEATURES, dtype=jnp.int32)

    out = sphere_product(x, weight, label, m=M, iter_count=1)
    jax.block_until_ready(out)

    ref = sphere_product_reference(x, weight, label, m=M, iter_count=1)
    np.testing.assert_allclose(np.asarray(out), np.asarray(ref), atol=2e-4, rtol=2e-4)
    assert out.shape == (N, OUT_FEATURES) and out.dtype == jnp.float32
    print("KERNEL_OK")
</pallas_src>

<mosaic_0001>
module attributes {stable_mosaic.version = 11 : i64} {
  func.func @_normalize_rows_kernel(%arg0: i32, %arg1: memref<128x128xf32, #tpu.memory_space<vmem>>, %arg2: memref<128x128xf32, #tpu.memory_space<vmem>>) attributes {dimension_semantics = [#tpu.dimension_semantics<parallel>], iteration_bounds = array<i64: 1>, scalar_prefetch = 0 : i64, scratch_operands = 0 : i64, tpu.core_type = #tpu.core_type<tc>, window_params = [{transform_indices = @transform_0, window_bounds = array<i64: 128, 128>}, {transform_indices = @transform_1, window_bounds = array<i64: 128, 128>}]} {
    %c0 = arith.constant 0 : index
    %c0_0 = arith.constant 0 : index
    %0 = vector.load %arg1[%c0, %c0_0] : memref<128x128xf32, #tpu.memory_space<vmem>>, vector<128x128xf32>
    %1 = arith.mulf %0, %0 : vector<128x128xf32>
    %cst = arith.constant dense<0.000000e+00> : vector<128xf32>
    %2 = vector.multi_reduction <add>, %1, %cst [1] : vector<128x128xf32> to vector<128xf32>
    %3 = vector.shape_cast %2 : vector<128xf32> to vector<128x1xf32>
    %cst_1 = arith.constant 1.000000e-24 : f32
    %4 = vector.broadcast %cst_1 : f32 to vector<128x1xf32>
    %5 = arith.maximumf %3, %4 : vector<128x1xf32>
    %6 = math.rsqrt %5 : vector<128x1xf32>
    %7 = vector.broadcast %6 : vector<128x1xf32> to vector<128x128xf32>
    %8 = arith.mulf %0, %7 : vector<128x128xf32>
    %c0_2 = arith.constant 0 : index
    %c0_3 = arith.constant 0 : index
    %9 = vector.load %arg2[%c0_2, %c0_3] : memref<128x128xf32, #tpu.memory_space<vmem>>, vector<128x128xf32>
    tpu.vector_store %arg2[%c0_2, %c0_3], %8 {strides = array<i32>} : memref<128x128xf32, #tpu.memory_space<vmem>>, vector<128x128xf32>,
    return
  }
  func.func @transform_0(%arg0: i32) -> (i32, i32) {
    %c0_i32 = arith.constant 0 : i32
    %c0_i32_0 = arith.constant 0 : i32
    return %arg0, %c0_i32 : i32, i32
  }
  func.func @transform_1(%arg0: i32) -> (i32, i32) {
    %c0_i32 = arith.constant 0 : i32
    %c0_i32_0 = arith.constant 0 : i32
    return %arg0, %c0_i32 : i32, i32
  }
}

</mosaic_0001>

<bundles_post_ra>
// kernel: tpu_custom_call.1
= control target key start
LH: loop header
LB: loop body
LE: loop exit
PB: predicated region body
PF: predicated region fallthrough
CT: control target
= control target key end

     0   :  { %6 = vsyncpa [#allocation3], 0  ;;  %s354_s0 = inlined_call_operand.hbm [shape: f32[128,128], index: 0, kind: input, shape index: {}]   ;;  %s355_s1 = inlined_call_operand.hbm [shape: f32[128,128], index: 1, kind: output, shape index: {}]  }
   0x1   :  { %7 = vsyncpa [#allocation4], 0  ;;  %s248_s6 = smov [#allocation2]  }
   0x2   :  { %s13_s7 = sshll.u32 %s248_s6, 4  ;;  %s14_s7 = int_to_ptr.vmem [resolvable:$true] %s13_s7 }
   0x3   :  { %s212_s8 = scalar_lea.vmem %s14_s7, 2048  ;;  %p217_p1 = scmp.lt.s32.totalorder %s14_s7, %s14_s7 }
   0x4   :  { %p213_p0 = scmp.ne.s32.totalorder %s14_s7, %s212_s8  ;;  %p218_p2 = scmp.lt.s32.totalorder %s212_s8, %s212_s8 }
   0x6   :  { %p219_p3 = por %p218_p2, %p217_p1 }
   0x8   :  { %p220_p4 = pnand %p219_p3, %p213_p0 }
   0xa   :  { %223 = shalt.err (!%p220_p4)
}
   0xb   :  { %s249_s9 = smov 128   ;;  %s250_s10 = smov 8  }
   0xc   :  { %19 = dma.hbm_to_vmem [thread:$0]  %s354_s0, 2048, %s14_s7, [#allocation3], %s249_s9, %s249_s9, %s250_s10  }
   0xd   :  { %244 = dma.done.wait [#allocation3], 2048  }
   0xe   :  { %245 = vsyncadd [#allocation3], 4294965248  ;;  %v268_v0 = vld [vmem:[#allocation2 + $0x10] sm:$0xff]  ;;  %v270_v1 = vld [vmem:[#allocation2] sm:$0xff]  ;;  %s251_s0 = smov [#allocation5]  }
   0xf   :  { %v272_v2 = vld [vmem:[#allocation2 + $0x18] sm:$0xff]  ;;  %v41_v3 = vmul.f32 %v268_v0, %v268_v0  ;;  %v39_v4 = vmul.f32 %v270_v1, %v270_v1  ;;  %v278_v5 = vld [vmem:[#allocation2 + $0x8] sm:$0xff]  ;;  %v286_v9 = vld [vmem:[#allocation2 + $0x20] sm:$0xff]  ;;  %s156_s13 = sshll.u32 %s251_s0, 4  ;;  %s157_s13 = int_to_ptr.vmem [resolvable:$true] %s156_s13 }
  0x10   :  { %v42_v6 = vmul.f32 %v272_v2, %v272_v2  ;;  %v40_v7 = vmul.f32 %v278_v5, %v278_v5  ;;  %v284_v8 = vld [vmem:[#allocation2 + $0x28] sm:$0xff]  ;;  %v43_v11 = vmul.f32 %v286_v9, %v286_v9  ;;  %v292_v12 = vld [vmem:[#allocation2 + $0x38] sm:$0xff]  ;;  %v294_v13 = vld [vmem:[#allocation2 + $0x30] sm:$0xff]  ;;  %s224_s14 = scalar_lea.vmem %s157_s13, 2048  ;;  %p229_p6 = scmp.lt.s32.totalorder %s157_s13, %s157_s13 }
  0x11   :  { %59 = vadd.xlane.f32.xlu1 %v41_v3  ;;  %55 = vadd.xlane.f32.xlu0 %v39_v4  ;;  %v44_v10 = vmul.f32 %v284_v8, %v284_v8  ;;  %v46_v14 = vmul.f32 %v292_v12, %v292_v12  ;;  %v45_v15 = vmul.f32 %v294_v13, %v294_v13  ;;  %v300_v16 = vld [vmem:[#allocation2 + $0x48] sm:$0xff]  ;;  %v302_v17 = vld [vmem:[#allocation2 + $0x40] sm:$0xff]  ;;  %v308_v20 = vld [vmem:[#allocation2 + $0x58] sm:$0xff]  ;;  %p225_p5 = scmp.ne.s32.totalorder %s157_s13, %s224_s14  ;;  %p230_p7 = scmp.lt.s32.totalorder %s224_s14, %s224_s14 }
  0x12   :  { %v48_v18 = vmul.f32 %v300_v16, %v300_v16  ;;  %v47_v19 = vmul.f32 %v302_v17, %v302_v17  ;;  %v310_v21 = vld [vmem:[#allocation2 + $0x50] sm:$0xff]  ;;  %v50_v22 = vmul.f32 %v308_v20, %v308_v20  ;;  %v316_v24 = vld [vmem:[#allocation2 + $0x68] sm:$0xff]  ;;  %v318_v25 = vld [vmem:[#allocation2 + $0x60] sm:$0xff] }
  0x13   :  { %v49_v23 = vmul.f32 %v310_v21, %v310_v21  ;;  %v52_v26 = vmul.f32 %v316_v24, %v316_v24  ;;  %v51_v27 = vmul.f32 %v318_v25, %v318_v25  ;;  %v324_v28 = vld [vmem:[#allocation2 + $0x78] sm:$0xff]  ;;  %v326_v29 = vld [vmem:[#allocation2 + $0x70] sm:$0xff]  ;;  %p231_p8 = por %p230_p7, %p229_p6 }
  0x14   :  { %v54_v30 = vmul.f32 %v324_v28, %v324_v28  ;;  %v53_v31 = vmul.f32 %v326_v29, %v326_v29 }
  0x15   :  { %61 = vadd.xlane.f32.xlu1 %v42_v6  ;;  %57 = vadd.xlane.f32.xlu0 %v40_v7  ;;  %p232_p9 = pnand %p231_p8, %p225_p5 }
  0x19   :  { %65 = vadd.xlane.f32.xlu1 %v44_v10  ;;  %63 = vadd.xlane.f32.xlu0 %v43_v11 }
  0x1d   :  { %69 = vadd.xlane.f32.xlu1 %v46_v14  ;;  %67 = vadd.xlane.f32.xlu0 %v45_v15 }
  0x21   :  { %73 = vadd.xlane.f32.xlu1 %v48_v18  ;;  %71 = vadd.xlane.f32.xlu0 %v47_v19 }
  0x25   :  { %77 = vadd.xlane.f32.xlu1 %v50_v22  ;;  %75 = vadd.xlane.f32.xlu0 %v49_v23 }
  0x29   :  { %81 = vadd.xlane.f32.xlu1 %v52_v26  ;;  %79 = vadd.xlane.f32.xlu0 %v51_v27 }
  0x2d   :  { %85 = vadd.xlane.f32.xlu1 %v54_v30  ;;  %83 = vadd.xlane.f32.xlu0 %v53_v31 }
  0x9a   :  { %v60_v32 = vpop.xlane.xlu1 %59  ;;  %v56_v33 = vpop.xlane.xlu0 %55 }
  0x9b   :  { %v89_v34 = vmax.f32 %v60_v32, 1e-24  ;;  %v87_v35 = vmax.f32 %v56_v33, 1e-24 }
  0x9d   :  { %172 = vrsqrt.f32 %v89_v34 }
  0x9e   :  { %174 = vrsqrt.f32 %v87_v35  ;;  %v62_v36 = vpop.xlane.xlu1 %61  ;;  %v58_v37 = vpop.xlane.xlu0 %57 }
  0x9f   :  { %v90_v38 = vmax.f32 %v62_v36, 1e-24  ;;  %v88_v39 = vmax.f32 %v58_v37, 1e-24 }
  0xa1   :  { %176 = vrsqrt.f32 %v90_v38 }
  0xa2   :  { %178 = vrsqrt.f32 %v88_v39  ;;  %v66_v40 = vpop.xlane.xlu1 %65  ;;  %v64_v41 = vpop.xlane.xlu0 %63 }
  0xa3   :  { %v92_v42 = vmax.f32 %v66_v40, 1e-24  ;;  %v91_v43 = vmax.f32 %v64_v41, 1e-24 }
  0xa5   :  { %180 = vrsqrt.f32 %v92_v42 }
  0xa6   :  { %182 = vrsqrt.f32 %v91_v43  ;;  %v70_v44 = vpop.xlane.xlu1 %69  ;;  %v68_v45 = vpop.xlane.xlu0 %67 }
  0xa7   :  { %v94_v46 = vmax.f32 %v70_v44, 1e-24  ;;  %v93_v47 = vmax.f32 %v68_v45, 1e-24 }
  0xa9   :  { %184 = vrsqrt.f32 %v94_v46 }
  0xaa   :  { %v173_v48 = vpop.eup %172  ;;  %186 = vrsqrt.f32 %v93_v47  ;;  %v74_v49 = vpop.xlane.xlu1 %73 }
  0xab   :  { %v72_v50 = vpop.xlane.xlu0 %71  ;;  %v175_v51 = vpop.eup %174  ;;  %v121_v52 = vmul.f32 %v173_v48, %v268_v0  ;;  %v96_v53 = vmax.f32 %v74_v49, 1e-24 }
  0xac   :  { %v95_v54 = vmax.f32 %v72_v50, 1e-24  ;;  %v119_v55 = vmul.f32 %v175_v51, %v270_v1 }
  0xad   :  { %137 = vst [vmem:[#allocation5 + $0x10] sm:$0xff] %v121_v52  ;;  %188 = vrsqrt.f32 %v96_v53 }
  0xae   :  { %v177_v56 = vpop.eup %176  ;;  %135 = vst [vmem:[#allocation5] sm:$0xff] %v119_v55  ;;  %190 = vrsqrt.f32 %v95_v54  ;;  %v78_v57 = vpop.xlane.xlu1 %77 }
  0xaf   :  { %v76_v58 = vpop.xlane.xlu0 %75  ;;  %v179_v59 = vpop.eup %178  ;;  %v122_v60 = vmul.f32 %v177_v56, %v272_v2  ;;  %v98_v61 = vmax.f32 %v78_v57, 1e-24 }
  0xb0   :  { %v97_v62 = vmax.f32 %v76_v58, 1e-24  ;;  %v120_v63 = vmul.f32 %v179_v59, %v278_v5 }
  0xb1   :  { %138 = vst [vmem:[#allocation5 + $0x18] sm:$0xff] %v122_v60  ;;  %192 = vrsqrt.f32 %v98_v61 }
  0xb2   :  { %v181_v0 = vpop.eup %180  ;;  %136 = vst [vmem:[#allocation5 + $0x8] sm:$0xff] %v120_v63  ;;  %194 = vrsqrt.f32 %v97_v62  ;;  %v82_v1 = vpop.xlane.xlu1 %81 }
  0xb3   :  { %v80_v3 = vpop.xlane.xlu0 %79  ;;  %v183_v4 = vpop.eup %182  ;;  %v124_v6 = vmul.f32 %v181_v0, %v284_v8  ;;  %v100_v7 = vmax.f32 %v82_v1, 1e-24 }
  0xb4   :  { %v99_v10 = vmax.f32 %v80_v3, 1e-24  ;;  %v123_v11 = vmul.f32 %v183_v4, %v286_v9 }
  0xb5   :  { %140 = vst [vmem:[#allocation5 + $0x28] sm:$0xff] %v124_v6  ;;  %196 = vrsqrt.f32 %v100_v7 }
  0xb6   :  { %v185_v2 = vpop.eup %184  ;;  %139 = vst [vmem:[#allocation5 + $0x20] sm:$0xff] %v123_v11  ;;  %198 = vrsqrt.f32 %v99_v10  ;;  %v86_v5 = vpop.xlane.xlu1 %85 }
  0xb7   :  { %v84_v14 = vpop.xlane.xlu0 %83  ;;  %v187_v15 = vpop.eup %186  ;;  %v126_v18 = vmul.f32 %v185_v2, %v292_v12  ;;  %v102_v19 = vmax.f32 %v86_v5, 1e-24 }
  0xb8   :  { %v101_v22 = vmax.f32 %v84_v14, 1e-24  ;;  %v125_v23 = vmul.f32 %v187_v15, %v294_v13 }
  0xb9   :  { %142 = vst [vmem:[#allocation5 + $0x38] sm:$0xff] %v126_v18  ;;  %200 = vrsqrt.f32 %v102_v19 }
  0xba   :  { %v189_v8 = vpop.eup %188  ;;  %141 = vst [vmem:[#allocation5 + $0x30] sm:$0xff] %v125_v23  ;;  %202 = vrsqrt.f32 %v101_v22 }
  0xbb   :  { %v191_v9 = vpop.eup %190  ;;  %v128_v26 = vmul.f32 %v189_v8, %v300_v16 }
  0xbc   :  { %v127_v27 = vmul.f32 %v191_v9, %v302_v17 }
  0xbd   :  { %144 = vst [vmem:[#allocation5 + $0x48] sm:$0xff] %v128_v26 }
  0xbe   :  { %v193_v30 = vpop.eup %192  ;;  %143 = vst [vmem:[#allocation5 + $0x40] sm:$0xff] %v127_v27 }
  0xbf   :  { %v195_v31 = vpop.eup %194  ;;  %v130_v12 = vmul.f32 %v193_v30, %v308_v20 }
  0xc0   :  { %v129_v32 = vmul.f32 %v195_v31, %v310_v21 }
  0xc1   :  { %146 = vst [vmem:[#allocation5 + $0x58] sm:$0xff] %v130_v12 }
  0xc2   :  { %v197_v13 = vpop.eup %196  ;;  %145 = vst [vmem:[#allocation5 + $0x50] sm:$0xff] %v129_v32 }
  0xc3   :  { %v199_v33 = vpop.eup %198  ;;  %v132_v34 = vmul.f32 %v197_v13, %v316_v24 }
  0xc4   :  { %v131_v35 = vmul.f32 %v199_v33, %v318_v25 }
  0xc5   :  { %148 = vst [vmem:[#allocation5 + $0x68] sm:$0xff] %v132_v34 }
  0xc6   :  { %v201_v16 = vpop.eup %200  ;;  %147 = vst [vmem:[#allocation5 + $0x60] sm:$0xff] %v131_v35 }
  0xc7   :  { %v203_v17 = vpop.eup %202  ;;  %v134_v36 = vmul.f32 %v201_v16, %v324_v28 }
  0xc8   :  { %v133_v20 = vmul.f32 %v203_v17, %v326_v29 }
  0xc9   :  { %150 = vst [vmem:[#allocation5 + $0x78] sm:$0xff] %v134_v36 }
  0xca   :  { %149 = vst [vmem:[#allocation5 + $0x70] sm:$0xff] %v133_v20 }
  0xcb   :  { %235 = shalt.err (!%p232_p9)
}
  0xcc   :  { %162 = dma.vmem_to_hbm [thread:$0]  %s157_s13, 2048, %s355_s1, [#allocation4], %s249_s9, %s249_s9, %s250_s10  }
  0xcd   :  { %246 = dma.done.wait [#allocation4], 2048  }
  0xce   :  { %247 = vsyncadd [#allocation4], 4294965248 }
  0xcf   :  { %166 = vsyncpa [#allocation3], 1 }
  0xd0   :  { %167 = vsyncpa [#allocation4], 1 }

</bundles_post_ra>
